<compile_context>
chip_gen: v7x
topology: tpu7x:2x2x1
jax: 0.10.0
libtpu: 0.0.40
codegen_flags: <defaults>
</compile_context>

<pallas_src>
import functools

import jax
import jax.numpy as jnp
from jax.experimental import pallas as pl
from jax.experimental.pallas import tpu as pltpu


GAMMA = 2.0
ALPHA = 0.8
IGNORE_INDEX = -100
BN_EPS = 1e-5
NEG_PAD = -1e30          # bias for lane-padding columns: keeps max/lse over real classes exact


def _round_up(x, m):
    return ((x + m - 1) // m) * m


@functools.lru_cache(maxsize=None)
def _buffered_resident_supported():
    """Probe pl.Buffered(1) (single-buffer resident operands) on this Pallas install.

    Falls back to default double-buffering if construction, compilation or numerics
    fail, so the main kernel always runs.
    """
    try:
        def k(w_ref, o_ref):
            o_ref[...] = w_ref[...] * 2.0

        f = pl.pallas_call(
            k,
            grid=(2,),
            in_specs=[pl.BlockSpec((8, 128), lambda i: (0, 0),
                                   pipeline_mode=pl.Buffered(1))],
            out_specs=pl.BlockSpec((8, 128), lambda i: (i, 0)),
            out_shape=jax.ShapeDtypeStruct((16, 128), jnp.float32),
        )
        out = jax.block_until_ready(f(jnp.ones((8, 128), jnp.float32)))
        return bool(jnp.allclose(out, 2.0))
    except Exception:
        return False


@functools.lru_cache(maxsize=None)
def _vmem_config():
    """Per-generation sizing.

    128 MiB VMEM parts (v5e/v6e): single TensorCore, plenty of headroom -> larger tiles
    and a 64 MiB scoped limit.  64 MiB parts (v7x-class): 32 MiB scoped budget, two
    TensorCores -> conservative tiles and >= 2 grid steps when possible.
    """
    vmem_bytes = 64 * 1024 * 1024
    try:
        info = pltpu.get_tpu_info()
        vmem_bytes = int(getattr(info, "vmem_capacity_bytes", vmem_bytes))
    except Exception:
        pass
    if vmem_bytes >= 128 * 1024 * 1024:
        return {"vmem_limit": 64 * 1024 * 1024, "budget": 48 * 1024 * 1024,
                "tile_cap": 1024, "min_grid": 1}
    return {"vmem_limit": 32 * 1024 * 1024, "budget": 20 * 1024 * 1024,
            "tile_cap": 512, "min_grid": 2}


def _choose_tile_n(n, hidden, fc_hidden, l_pad, x_itemsize, cfg, resident_bufs):
    """Row tile sized against the FULL working set, resident weights included."""
    resident = resident_bufs * (hidden * fc_hidden * 2      # w1' (bf16)
                                + fc_hidden * 4             # b1' (f32)
                                + fc_hidden * l_pad * 2     # w2  (bf16)
                                + l_pad * 4)                # b2  (f32)
    per_row = (2 * hidden * x_itemsize       # double-buffered streamed x tile
               + 2 * l_pad * 4               # double-buffered f32 logits tile
               + 2 * fc_hidden * 4           # f32 fc1 intermediate + ReLU copy
               + l_pad * 4                   # one-hot column used for the label gather
               + 16)                         # lane-dense labels + slack
    avail = max(cfg["budget"] - resident, per_row * 128)
    t = max(128, min(cfg["tile_cap"], (avail // per_row // 128) * 128))
    if n <= t:
        if cfg["min_grid"] >= 2 and n > 128:
            # 2-TC parts: split into >= 2 grid steps so both TensorCores get work;
            # tiles stay multiples of 128 so the lane-dense label block is (8,128)-clean.
            return min(t, _round_up((n + 1) // 2, 128))
        return _round_up(n, 16)              # single tile == full (padded) array
    return t


def _head_focal_kernel(x_ref, lab_ref, w1_ref, b1_ref, w2_ref, b2_ref,
                       logits_ref, pnll_ref, *, num_labels):
    """One row-tile: BN-folded classifier head + partial focal-CE (NLL) sum."""
    # fc1 (both BatchNorms folded into w1'/b1').  x cast to bf16 in-register (VPU cast
    # hidden under the MXU) -- no standalone HBM convert pass in the wrapper.
    x = x_ref[...].astype(jnp.bfloat16)
    h = jnp.dot(x, w1_ref[...], preferred_element_type=jnp.float32) + b1_ref[...]
    hr = jnp.maximum(h, 0.0)                             # ReLU (Dropout = identity in eval)

    # fc2 also in bf16 (native MXU path on v5e; halves w2 VMEM/traffic); bias add in f32.
    logits = jnp.dot(hr.astype(jnp.bfloat16), w2_ref[...],
                     preferred_element_type=jnp.float32) + b2_ref[...]
    logits_ref[...] = logits.astype(logits_ref.dtype)    # lane-dense (T, L_pad) store

    # ---- per-tile partial sum of the masked NLL (transpose-free) --------------------
    tile_n, l_pad = logits.shape
    labels = lab_ref[...]                                        # (1, T) int32, lane-dense
    validf = (labels != IGNORE_INDEX).astype(jnp.float32)        # (1, T)

    m = jnp.max(logits, axis=-1, keepdims=True)                  # (T, 1)
    lse = m + jnp.log(jnp.sum(jnp.exp(logits - m), axis=-1, keepdims=True))  # (T, 1)

    # sum_r valid_r * lse_r : (1,T)@(T,1) on the MXU -- avoids any lane->sublane transpose
    s_lse = jnp.dot(validf, lse, preferred_element_type=jnp.float32)          # (1, 1)

    # sum_r logits[r, label_r] via trace(onehot_T @ logits); the `cls < num_labels` mask
    # keeps ignored (-100), out-of-range and lane-pad labels at a 0 contribution.
    cls = jax.lax.broadcasted_iota(jnp.int32, (l_pad, tile_n), 0)             # (L, T)
    onehot_t = ((labels == cls) & (cls < num_labels)).astype(jnp.float32)     # (L, T)
    sel_mat = jnp.dot(onehot_t, logits, preferred_element_type=jnp.float32)   # (L, L)
    eye = (jax.lax.broadcasted_iota(jnp.int32, (l_pad, l_pad), 0) ==
           jax.lax.broadcasted_iota(jnp.int32, (l_pad, l_pad), 1)).astype(jnp.float32)
    s_sel = jnp.sum(sel_mat * eye)                                            # scalar

    pnll_ref[0] = s_lse - s_sel                                               # (1, 1)


def classifier_and_loss(x_flat, labels_flat, params):
    """x_flat: (N, H) bf16/f32, labels_flat: (N,) int32 -> (logits (N, L) f32, loss scalar)."""
    n, hidden = x_flat.shape
    w1, b1 = params["w1"], params["b1"]
    w2, b2 = params["w2"], params["b2"]
    fc_hidden = w1.shape[1]
    num_labels = w2.shape[1]

    # ---- fold eval-mode BatchNorms into fc1 (exact for inference) -------------------
    # Folding is done in f32 before the bf16 cast; extreme BN stats (tiny variances)
    # would amplify bf16 rounding -- fine for this model, re-check unusual checkpoints.
    s1 = params["bn1_g"] * jax.lax.rsqrt(params["bn1_v"] + BN_EPS)   # (1, H)
    t1 = params["bn1_b"] - params["bn1_m"] * s1
    s2 = params["bn2_g"] * jax.lax.rsqrt(params["bn2_v"] + BN_EPS)   # (1, F)
    t2 = params["bn2_b"] - params["bn2_m"] * s2
    w1f = (w1 * s1.reshape(hidden, 1)) * s2                          # (H, F)
    b1f = (t1 @ w1 + b1) * s2 + t2                                   # (1, F)

    # ---- lane-dense logits: pad fc2 output to a multiple of 128 lanes ---------------
    # zero weights + NEG_PAD bias keep max/lse over the real classes exact.
    l_pad = max(128, _round_up(num_labels, 128))
    if l_pad != num_labels:
        w2p = jnp.pad(w2, ((0, 0), (0, l_pad - num_labels)))
        b2p = jnp.pad(b2, ((0, 0), (0, l_pad - num_labels)), constant_values=NEG_PAD)
    else:
        w2p, b2p = w2, b2

    # ---- label-only reductions (cheap) stay in XLA -----------------------------------
    valid_f = (labels_flat != IGNORE_INDEX).astype(jnp.float32)
    # NOTE: max(count, 1) is an intentional divergence: an all-ignored batch returns
    # loss 0 here instead of PyTorch's NaN.
    count = jnp.maximum(jnp.sum(valid_f), 1.0)
    alpha_sum = jnp.sum(jnp.where(labels_flat == 1, ALPHA, 1.0) * valid_f)

    # ---- per-generation tiling --------------------------------------------------------
    cfg = _vmem_config()
    use_buffered = _buffered_resident_supported()
    resident_bufs = 1 if use_buffered else 2
    x_itemsize = jnp.dtype(x_flat.dtype).itemsize
    tile_n = _choose_tile_n(n, hidden, fc_hidden, l_pad, x_itemsize, cfg, resident_bufs)
    n_pad = _round_up(n, tile_n)
    grid = n_pad // tile_n
    if n_pad != n:
        x_flat = jnp.pad(x_flat, ((0, n_pad - n), (0, 0)))
        labels_flat_p = jnp.pad(labels_flat, (0, n_pad - n), constant_values=IGNORE_INDEX)
    else:
        labels_flat_p = labels_flat

    # x streams in its producer dtype (bf16 from the embedding path, or f32); the bf16
    # cast for the MXU happens inside the kernel -> no standalone convert pass over HBM.
    w1_bf = w1f.astype(jnp.bfloat16)
    w2_bf = w2p.astype(jnp.bfloat16)
    labels_2d = labels_flat_p.reshape(1, n_pad).astype(jnp.int32)    # lane-dense labels

    def _resident(shape):
        if use_buffered:
            return pl.BlockSpec(shape, lambda i: (0, 0), pipeline_mode=pl.Buffered(1))
        return pl.BlockSpec(shape, lambda i: (0, 0))

    cost = pl.CostEstimate(
        flops=int(2 * n_pad * (hidden * fc_hidden + fc_hidden * l_pad + 2 * l_pad)),
        transcendentals=int(n_pad * l_pad + n_pad),
        bytes_accessed=int(n_pad * hidden * x_itemsize + n_pad * 4
                           + hidden * fc_hidden * 2 + fc_hidden * 4
                           + fc_hidden * l_pad * 2 + l_pad * 4
                           + n_pad * l_pad * 4 + grid * 4),
    )

    logits_pad, pnll = pl.pallas_call(
        functools.partial(_head_focal_kernel, num_labels=num_labels),
        grid=(grid,),
        in_specs=[
            pl.BlockSpec((tile_n, hidden), lambda i: (i, 0)),        # x: streamed row tiles
            pl.BlockSpec((1, tile_n), lambda i: (0, i)),             # labels: lane-dense
            _resident((hidden, fc_hidden)),                          # w1' (bf16, resident)
            _resident((1, fc_hidden)),                               # b1' (f32, resident)
            _resident((fc_hidden, l_pad)),                           # w2  (bf16, resident)
            _resident((1, l_pad)),                                   # b2  (f32, resident)
        ],
        out_specs=(
            pl.BlockSpec((tile_n, l_pad), lambda i: (i, 0)),         # lane-dense logits tile
            pl.BlockSpec((1, 1, 1), lambda i: (i, 0, 0)),            # per-tile NLL sum
        ),
        out_shape=(
            jax.ShapeDtypeStruct((n_pad, l_pad), jnp.float32),
            jax.ShapeDtypeStruct((grid, 1, 1), jnp.float32),
        ),
        cost_estimate=cost,
        compiler_params=pltpu.CompilerParams(
            dimension_semantics=("parallel",),          # tiles independent -> megacore
            vmem_limit_bytes=cfg["vmem_limit"],
        ),
    )(x_flat, labels_2d, w1_bf, b1f, w2_bf, b2p)

    logits = logits_pad[:n, :num_labels]

    # ---- scalar focal-loss finalization (off the hot path) ---------------------------
    ce = jnp.sum(pnll) / count
    pt = jnp.exp(-ce)
    focal_term = (1.0 - pt) ** GAMMA            # general gamma (no longer hardcoded to 2)
    loss = focal_term * ce * (alpha_sum / count)
    return logits, loss


def esm_for_sequence_labeling_forward(input_ids, labels, emb_table, params):
    """Full forward.  The ESM backbone is replaced by an embedding lookup (glue)."""
    batch, seq_len = input_ids.shape
    hidden = emb_table.shape[1]
    # TODO(synk): pretrained ESM transformer stack (AutoModelForMaskedLM) not translated;
    # replaced by a deterministic embedding lookup producing hidden_states[-1].
    # The table is cast to bf16 so the gather emits bf16 activations directly and the
    # kernel's dominant x stream is read from HBM once at half width (no extra convert).
    sequence_output = jnp.take(emb_table.astype(jnp.bfloat16), input_ids, axis=0)  # (B,S,H)
    x_flat = sequence_output.reshape(batch * seq_len, hidden)
    labels_flat = labels.reshape(batch * seq_len)
    logits_flat, loss = classifier_and_loss(x_flat, labels_flat, params)
    logits = logits_flat.reshape(batch, seq_len, -1)
    return loss, logits


# ---------------------------------------------------------------------------
# pure-JAX reference for verification (original un-folded f32 semantics)
# ---------------------------------------------------------------------------
def _reference(x_flat, labels_flat, params):
    x = x_flat
    xb = (x - params["bn1_m"]) / jnp.sqrt(params["bn1_v"] + BN_EPS) * params["bn1_g"] + params["bn1_b"]
    h = xb @ params["w1"] + params["b1"]
    hb = (h - params["bn2_m"]) / jnp.sqrt(params["bn2_v"] + BN_EPS) * params["bn2_g"] + params["bn2_b"]
    hr = jnp.maximum(hb, 0.0)
    logits = hr @ params["w2"] + params["b2"]

    valid = labels_flat != IGNORE_INDEX
    safe = jnp.where(valid, labels_flat, 0)
    logp = jax.nn.log_softmax(logits, axis=-1)
    nll = -jnp.take_along_axis(logp, safe[:, None], axis=-1)[:, 0]
    count = jnp.sum(valid.astype(jnp.float32))
    ce = jnp.sum(nll * valid) / count
    pt = jnp.exp(-ce)
    focal = (1.0 - pt) ** GAMMA * ce
    alpha = jnp.where(labels_flat == 1, ALPHA, 1.0)
    loss = focal * jnp.sum(alpha * valid) / count
    return logits, loss


def make_params(key, hidden, fc_hidden, num_labels):
    k1, k2, k3, k4, k5 = jax.random.split(key, 5)
    scale1 = 1.0 / jnp.sqrt(hidden)
    scale2 = 1.0 / jnp.sqrt(fc_hidden)
    return {
        # BatchNorm1d(hidden)
        "bn1_g": jnp.ones((1, hidden), jnp.float32),
        "bn1_b": jnp.zeros((1, hidden), jnp.float32),
        "bn1_m": jax.random.normal(k1, (1, hidden), jnp.float32) * 0.1,
        "bn1_v": jnp.ones((1, hidden), jnp.float32),
        # fc1: stored as (H, F) for x @ W
        "w1": jax.random.uniform(k2, (hidden, fc_hidden), jnp.float32, -scale1, scale1),
        "b1": jax.random.uniform(k3, (1, fc_hidden), jnp.float32, -scale1, scale1),
        # BatchNorm1d(fc_hidden)
        "bn2_g": jnp.ones((1, fc_hidden), jnp.float32),
        "bn2_b": jnp.zeros((1, fc_hidden), jnp.float32),
        "bn2_m": jnp.zeros((1, fc_hidden), jnp.float32),
        "bn2_v": jnp.ones((1, fc_hidden), jnp.float32),
        # fc_out: stored as (F, L)
        "w2": jax.random.uniform(k4, (fc_hidden, num_labels), jnp.float32, -scale2, scale2),
        "b2": jax.random.uniform(k5, (1, num_labels), jnp.float32, -scale2, scale2),
    }


if __name__ == "__main__":
    batch, seq_len = 2, 8
    hidden, fc_hidden, num_labels = 32, 128, 2
    vocab_size = 33  # ESM-style vocabulary

    key = jax.random.PRNGKey(0)
    k_ids, k_lab, k_emb, k_par = jax.random.split(key, 4)

    input_ids = jax.random.randint(k_ids, (batch, seq_len), 0, vocab_size, dtype=jnp.int32)
    labels = jax.random.randint(k_lab, (batch, seq_len), 0, num_labels, dtype=jnp.int32)
    # mark a couple of positions as ignore_index to exercise the mask
    labels = labels.at[0, 0].set(IGNORE_INDEX).at[1, 3].set(IGNORE_INDEX)

    emb_table = jax.random.normal(k_emb, (vocab_size, hidden), jnp.float32) * 0.5
    params = make_params(k_par, hidden, fc_hidden, num_labels)

    fwd = jax.jit(functools.partial(esm_for_sequence_labeling_forward,
                                    emb_table=emb_table, params=params))
    loss, logits = fwd(input_ids, labels)
    jax.block_until_ready((loss, logits))

    # verify against pure-JAX f32 reference (tolerances cover the bf16 MXU path)
    x_flat = jnp.take(emb_table, input_ids, axis=0).reshape(batch * seq_len, hidden)
    ref_logits, ref_loss = _reference(x_flat, labels.reshape(-1), params)
    assert logits.shape == (batch, seq_len, num_labels)
    assert jnp.allclose(logits.reshape(-1, num_labels), ref_logits, atol=2e-2, rtol=2e-2)
    assert jnp.allclose(loss, ref_loss, atol=2e-2, rtol=2e-2)

    print("KERNEL_OK")
</pallas_src>

<mosaic_0001>
module attributes {stable_mosaic.version = 11 : i64} {
  func.func @_head_focal_kernel(%arg0: i32, %arg1: memref<16x32xbf16, #tpu.memory_space<vmem>>, %arg2: memref<1x16xi32, #tpu.memory_space<vmem>>, %arg3: memref<32x128xbf16, #tpu.memory_space<vmem>>, %arg4: memref<1x128xf32, #tpu.memory_space<vmem>>, %arg5: memref<128x128xbf16, #tpu.memory_space<vmem>>, %arg6: memref<1x128xf32, #tpu.memory_space<vmem>>, %arg7: memref<16x128xf32, #tpu.memory_space<vmem>>, %arg8: memref<1x1x1xf32, #tpu.memory_space<vmem>>) attributes {dimension_semantics = [#tpu.dimension_semantics<parallel>], iteration_bounds = array<i64: 1>, scalar_prefetch = 0 : i64, scratch_operands = 0 : i64, tpu.core_type = #tpu.core_type<tc>, window_params = [{transform_indices = @transform_0, window_bounds = array<i64: 16, 32>}, {transform_indices = @transform_1, window_bounds = array<i64: 1, 16>}, {pipeline_mode = #tpu.pipeline_mode<synchronous>, transform_indices = @transform_2, window_bounds = array<i64: 32, 128>}, {pipeline_mode = #tpu.pipeline_mode<synchronous>, transform_indices = @transform_3, window_bounds = array<i64: 1, 128>}, {pipeline_mode = #tpu.pipeline_mode<synchronous>, transform_indices = @transform_4, window_bounds = array<i64: 128, 128>}, {pipeline_mode = #tpu.pipeline_mode<synchronous>, transform_indices = @transform_5, window_bounds = array<i64: 1, 128>}, {transform_indices = @transform_6, window_bounds = array<i64: 16, 128>}, {transform_indices = @transform_7, window_bounds = array<i64: 1, 1, 1>}]} {
    %c0 = arith.constant 0 : index
    %c0_0 = arith.constant 0 : index
    %0 = vector.load %arg1[%c0, %c0_0] : memref<16x32xbf16, #tpu.memory_space<vmem>>, vector<16x32xbf16>
    %c0_1 = arith.constant 0 : index
    %c0_2 = arith.constant 0 : index
    %1 = vector.load %arg3[%c0_1, %c0_2] : memref<32x128xbf16, #tpu.memory_space<vmem>>, vector<32x128xbf16>
    %cst = arith.constant dense<0.000000e+00> : vector<16x128xf32>
    %2 = tpu.matmul %0, %1, %cst {dimension_numbers = #tpu.dot_dimension_numbers<[1], [0], [0], [1], [0, 0, 1, 1], [], []>} : vector<16x32xbf16>, vector<32x128xbf16>, vector<16x128xf32> -> vector<16x128xf32>
    %c0_3 = arith.constant 0 : index
    %c0_4 = arith.constant 0 : index
    %3 = vector.load %arg4[%c0_3, %c0_4] : memref<1x128xf32, #tpu.memory_space<vmem>>, vector<1x128xf32>
    %4 = vector.broadcast %3 : vector<1x128xf32> to vector<16x128xf32>
    %5 = arith.addf %2, %4 : vector<16x128xf32>
    %cst_5 = arith.constant 0.000000e+00 : f32
    %6 = vector.broadcast %cst_5 : f32 to vector<16x128xf32>
    %7 = arith.maximumf %5, %6 : vector<16x128xf32>
    %8 = arith.truncf %7 : vector<16x128xf32> to vector<16x128xbf16>
    %c0_6 = arith.constant 0 : index
    %c0_7 = arith.constant 0 : index
    %9 = vector.load %arg5[%c0_6, %c0_7] : memref<128x128xbf16, #tpu.memory_space<vmem>>, vector<128x128xbf16>
    %cst_8 = arith.constant dense<0.000000e+00> : vector<16x128xf32>
    %10 = tpu.matmul %8, %9, %cst_8 {dimension_numbers = #tpu.dot_dimension_numbers<[1], [0], [0], [1], [0, 0, 1, 1], [], []>} : vector<16x128xbf16>, vector<128x128xbf16>, vector<16x128xf32> -> vector<16x128xf32>
    %c0_9 = arith.constant 0 : index
    %c0_10 = arith.constant 0 : index
    %11 = vector.load %arg6[%c0_9, %c0_10] : memref<1x128xf32, #tpu.memory_space<vmem>>, vector<1x128xf32>
    %12 = vector.broadcast %11 : vector<1x128xf32> to vector<16x128xf32>
    %13 = arith.addf %10, %12 : vector<16x128xf32>
    %c0_11 = arith.constant 0 : index
    %c0_12 = arith.constant 0 : index
    %14 = vector.load %arg7[%c0_11, %c0_12] : memref<16x128xf32, #tpu.memory_space<vmem>>, vector<16x128xf32>
    tpu.vector_store %arg7[%c0_11, %c0_12], %13 {strides = array<i32>} : memref<16x128xf32, #tpu.memory_space<vmem>>, vector<16x128xf32>,
    %c0_13 = arith.constant 0 : index
    %c0_14 = arith.constant 0 : index
    %15 = vector.load %arg2[%c0_13, %c0_14] : memref<1x16xi32, #tpu.memory_space<vmem>>, vector<1x16xi32>
    %c-100_i32 = arith.constant -100 : i32
    %16 = vector.broadcast %c-100_i32 : i32 to vector<1x16xi32>
    %17 = arith.cmpi ne, %15, %16 : vector<1x16xi32>
    %18 = arith.extui %17 : vector<1x16xi1> to vector<1x16xi32>
    %19 = arith.sitofp %18 : vector<1x16xi32> to vector<1x16xf32>
    %cst_15 = arith.constant dense<0xFF800000> : vector<16xf32>
    %20 = vector.multi_reduction <maximumf>, %13, %cst_15 [1] : vector<16x128xf32> to vector<16xf32>
    %21 = vector.shape_cast %20 : vector<16xf32> to vector<16x1xf32>
    %22 = vector.broadcast %21 : vector<16x1xf32> to vector<16x128xf32>
    %23 = arith.subf %13, %22 : vector<16x128xf32>
    %24 = math.exp %23 : vector<16x128xf32>
    %cst_16 = arith.constant dense<0.000000e+00> : vector<16xf32>
    %25 = vector.multi_reduction <add>, %24, %cst_16 [1] : vector<16x128xf32> to vector<16xf32>
    %26 = vector.shape_cast %25 : vector<16xf32> to vector<16x1xf32>
    %27 = math.log %26 : vector<16x1xf32>
    %28 = arith.addf %21, %27 : vector<16x1xf32>
    %cst_17 = arith.constant dense<0.000000e+00> : vector<1x1xf32>
    %29 = tpu.matmul %19, %28, %cst_17 {dimension_numbers = #tpu.dot_dimension_numbers<[1], [0], [0], [1], [0, 0, 1, 1], [], []>} : vector<1x16xf32>, vector<16x1xf32>, vector<1x1xf32> -> vector<1x1xf32>
    %30 = tpu.iota {dimensions = array<i32: 0>} : vector<128x16xi32>
    %31 = vector.broadcast %15 : vector<1x16xi32> to vector<128x16xi32>
    %32 = arith.cmpi eq, %31, %30 : vector<128x16xi32>
    %c2_i32 = arith.constant 2 : i32
    %33 = vector.broadcast %c2_i32 : i32 to vector<128x16xi32>
    %34 = arith.cmpi slt, %30, %33 : vector<128x16xi32>
    %35 = arith.andi %32, %34 : vector<128x16xi1>
    %36 = arith.extui %35 : vector<128x16xi1> to vector<128x16xi32>
    %37 = arith.sitofp %36 : vector<128x16xi32> to vector<128x16xf32>
    %cst_18 = arith.constant dense<0.000000e+00> : vector<128x128xf32>
    %38 = tpu.matmul %37, %13, %cst_18 {dimension_numbers = #tpu.dot_dimension_numbers<[1], [0], [0], [1], [0, 0, 1, 1], [], []>} : vector<128x16xf32>, vector<16x128xf32>, vector<128x128xf32> -> vector<128x128xf32>
    %39 = tpu.iota {dimensions = array<i32: 0>} : vector<128x128xi32>
    %40 = tpu.iota {dimensions = array<i32: 1>} : vector<128x128xi32>
    %41 = arith.cmpi eq, %39, %40 : vector<128x128xi32>
    %42 = arith.extui %41 : vector<128x128xi1> to vector<128x128xi32>
    %43 = arith.sitofp %42 : vector<128x128xi32> to vector<128x128xf32>
    %44 = arith.mulf %38, %43 : vector<128x128xf32>
    %45 = vector.shape_cast %44 : vector<128x128xf32> to vector<1x128x128xf32>
    %cst_19 = arith.constant dense<0.000000e+00> : vector<1xf32>
    %46 = vector.multi_reduction <add>, %45, %cst_19 [1, 2] : vector<1x128x128xf32> to vector<1xf32>
    %47 = vector.shape_cast %46 : vector<1xf32> to vector<1x1x1xf32>
    %48 = vector.extract %47[0, 0, 0] : f32 from vector<1x1x1xf32>
    %49 = vector.broadcast %48 : f32 to vector<1x1xf32>
    %50 = arith.subf %29, %49 : vector<1x1xf32>
    %c0_20 = arith.constant 0 : index
    %c0_21 = arith.constant 0 : index
    %c0_22 = arith.constant 0 : index
    %51 = vector.load %arg8[%c0_20, %c0_21, %c0_22] : memref<1x1x1xf32, #tpu.memory_space<vmem>>, vector<1x1x1xf32>
    %52 = vector.shape_cast %51 : vector<1x1x1xf32> to vector<1x1xf32>
    %53 = vector.shape_cast %50 : vector<1x1xf32> to vector<1x1x1xf32>
    tpu.vector_store %arg8[%c0_20, %c0_21, %c0_22], %53 {strides = array<i32>} : memref<1x1x1xf32, #tpu.memory_space<vmem>>, vector<1x1x1xf32>,
    return
  }
  func.func @transform_0(%arg0: i32) -> (i32, i32) {
    %c0_i32 = arith.constant 0 : i32
    %c0_i32_0 = arith.constant 0 : i32
    return %arg0, %c0_i32 : i32, i32
  }
  func.func @transform_1(%arg0: i32) -> (i32, i32) {
    %c0_i32 = arith.constant 0 : i32
    %c0_i32_0 = arith.constant 0 : i32
    return %c0_i32, %arg0 : i32, i32
  }
  func.func @transform_2(%arg0: i32) -> (i32, i32) {
    %c0_i32 = arith.constant 0 : i32
    %c0_i32_0 = arith.constant 0 : i32
    %c0_i32_1 = arith.constant 0 : i32
    return %c0_i32, %c0_i32_0 : i32, i32
  }
  func.func @transform_3(%arg0: i32) -> (i32, i32) {
    %c0_i32 = arith.constant 0 : i32
    %c0_i32_0 = arith.constant 0 : i32
    %c0_i32_1 = arith.constant 0 : i32
    return %c0_i32, %c0_i32_0 : i32, i32
  }
  func.func @transform_4(%arg0: i32) -> (i32, i32) {
    %c0_i32 = arith.constant 0 : i32
    %c0_i32_0 = arith.constant 0 : i32
    %c0_i32_1 = arith.constant 0 : i32
    return %c0_i32, %c0_i32_0 : i32, i32
  }
  func.func @transform_5(%arg0: i32) -> (i32, i32) {
    %c0_i32 = arith.constant 0 : i32
    %c0_i32_0 = arith.constant 0 : i32
    %c0_i32_1 = arith.constant 0 : i32
    return %c0_i32, %c0_i32_0 : i32, i32
  }
  func.func @transform_6(%arg0: i32) -> (i32, i32) {
    %c0_i32 = arith.constant 0 : i32
    %c0_i32_0 = arith.constant 0 : i32
    return %arg0, %c0_i32 : i32, i32
  }
  func.func @transform_7(%arg0: i32) -> (i32, i32, i32) {
    %c0_i32 = arith.constant 0 : i32
    %c0_i32_0 = arith.constant 0 : i32
    %c0_i32_1 = arith.constant 0 : i32
    return %arg0, %c0_i32, %c0_i32_0 : i32, i32, i32
  }
}

</mosaic_0001>

<bundles_post_ra>
// kernel: esm_for_sequence_labeling_forward.1
= control target key start
LH: loop header
LB: loop body
LE: loop exit
PB: predicated region body
PF: predicated region fallthrough
CT: control target
= control target key end

     0   :  { %v909_v1 = vmov 0.0   ;;  %vm910_vm0 = vmmov 0   ;;  %vm57_vm1 = vcmask 261120   ;;  %s1101_s0 = inlined_call_operand.vmem [shape: bf16[16,32], index: 0, kind: input, shape index: {}]   ;;  %s1102_s1 = inlined_call_operand.vmem [shape: s32[1,16], index: 1, kind: input, shape index: {}]   ;;  %s1103_s2 = inlined_call_operand.vmem [shape: bf16[32,128], index: 2, kind: input, shape index: {}]   ;;  %s1104_s3 = inlined_call_operand.vmem [shape: f32[1,128], index: 3, kind: input, shape index: {}]   ;;  %s1105_s4 = inlined_call_operand.vmem [shape: bf16[128,128], index: 4, kind: input, shape index: {}]   ;;  %s1106_s5 = inlined_call_operand.vmem [shape: f32[1,128], index: 5, kind: input, shape index: {}]   ;;  %s1107_s6 = inlined_call_operand.vmem [shape: f32[16,128], index: 6, kind: output, shape index: {0}]   ;;  %s1108_s7 = inlined_call_operand.hbm [shape: f32[1,1,1], index: 7, kind: output, shape index: {1}]  }
   0x1   :  { %v866_v0 = vld [vmem:[%s1103_s2] sm:$0xff]   ;;  %790 = vmatprep.subr.bf16.mxu1 %v909_v1  ;;  %v867_v2 = vld [vmem:[%s1103_s2 + $0x8] sm:$0xff]   ;;  %794 = vmatprep.mubr.msk.bf16.mxu1 %vm910_vm0, %v909_v1 }
   0x2   :  { %791 = vmatpush3.bf16.msra.mxu1 %v866_v0  ;;  %822 = vmatprep.mubr.msk.f32.mxu0 %vm910_vm0, %v909_v1  ;;  %v868_v3 = vld [vmem:[%s1101_s0] sm:$0xff]   ;;  %v870_v5 = vld [vmem:[%s1105_s4 + $0x8] sm:$0xff]  }
   0x3   :  { %792 = vmatprep.subr.bf16.mxu1 %v909_v1  ;;  %v869_v4 = vld [vmem:[%s1105_s4] sm:$0xff]  }
   0x6   :  { %793 = vmatpush3.bf16.msra.mxu1 %v867_v2 }
   0x7   :  { %798 = vmatprep.subr.bf16.mxu1 %v909_v1 }
   0x9   :  { %795 = vmatmul.mubr.msk.bf16.vlgmr.msra.gmra.mrb[0].mxu1 %vm57_vm1, %v868_v3 }
   0xa   :  { %799 = vmatpush3.bf16.msra.mxu1 %v869_v4  ;;  %814 = vmatprep.mubr.msk.bf16.mxu1 %vm910_vm0, %v909_v1 }
   0xb   :  { %13 = vsyncpa [#allocation3], 0  ;;  %800 = vmatprep.subr.bf16.mxu1 %v909_v1  ;;  %v871_v6 = vld [vmem:[%s1105_s4 + $0x10] sm:$0xff]   ;;  %v872_v7 = vld [vmem:[%s1105_s4 + $0x18] sm:$0xff]   ;;  %v911_v37 = vmov 0.0|0.0   ;;  %v317_v39 = vlaneseq  ;;  %vm243_vm6 = vcmask 130048  }
   0xc   :  { %v873_v8 = vld [vmem:[%s1105_s4 + $0x20] sm:$0xff]   ;;  %v874_v9 = vld [vmem:[%s1105_s4 + $0x28] sm:$0xff]   ;;  %v875_v10 = vld [vmem:[%s1105_s4 + $0x30] sm:$0xff]   ;;  %853 = vmatprep.subr.bf16.mxu0 %v911_v37 }
   0xd   :  { %v876_v11 = vld [vmem:[%s1105_s4 + $0x38] sm:$0xff]   ;;  %v723_v12 = vld [vmem:[%s1104_s3] ss:$0 sm:$0xff]  ;;  %v1011_v41 = vshrl.u32 %v317_v39, 7  ;;  %v1037_v56 = vand.u32 127, %v317_v39 }
   0xe   :  { %801 = vmatpush3.bf16.msra.mxu1 %v870_v5  ;;  %v728_v22 = vld [vmem:[%s1106_s5] ss:$0 sm:$0xff] }
   0xf   :  { %802 = vmatprep.subr.bf16.mxu1 %v909_v1  ;;  %v336_v42 = vsub.s32 0, %v1011_v41  ;;  %v219_v43 = vld [vmem:[%s1102_s1] sm:$0x1]  ;;  %vm354_vm3 = vcmp.lt.s32.totalorder %v1011_v41, 2  ;;  %v319_v55 = vadd.s32 8, %v1011_v41  ;;  %vm613_vm8 = vcmp.eq.s32.totalorder %v1011_v41, %v1037_v56  ;;  %s912_s1 = smov [#allocation2]  }
  0x10   :  { %vm220_vm4 = vcmp.ne.s32.totalorder %v219_v43, 4294967196  ;;  %v320_v58 = vadd.s32 16, %v1011_v41  ;;  %v321_v61 = vadd.s32 24, %v1011_v41  ;;  %v741_v62 = vsel %vm613_vm8, 1.0, %v909_v1  ;;  %s713_s27 = sshll.u32 %s912_s1, 4  ;;  %s714_s27 = int_to_ptr.vmem [resolvable:$true] %s713_s27 }
  0x11   :  { %v337_v45 = vrot.slane %v219_v43, %v336_v42  ;;  %v737_v53 = vsel %vm220_vm4, 1.0, %v909_v1  ;;  %vm614_vm7 = vcmp.eq.s32.totalorder %v319_v55, %v1037_v56  ;;  %v322_v0 = vadd.s32 32, %v1011_v41  ;;  %s885_s29 = scalar_lea.vmem %s714_s27, 16  ;;  %s889_s30 = scalar_lea.vmem %s714_s27, 32 }
  0x12   :  { %803 = vmatpush3.bf16.msra.mxu1 %v871_v6  ;;  %v742_v60 = vsel %vm614_vm7, 1.0, %v909_v1  ;;  %vm615_vm9 = vcmp.eq.s32.totalorder %v320_v58, %v1037_v56  ;;  %vm616_vm10 = vcmp.eq.s32.totalorder %v321_v61, %v1037_v56  ;;  %v323_v5 = vadd.s32 40, %v1011_v41  ;;  %p886_p0 = scmp.ne.s32.totalorder %s714_s27, %s885_s29  ;;  %p890_p1 = scmp.lt.s32.totalorder %s714_s27, %s714_s27 }
  0x13   :  { %804 = vmatprep.subr.bf16.mxu1 %v909_v1  ;;  %vm338_vm2 = vcmp.eq.s32.totalorder %v337_v45, %v1011_v41  ;;  %v743_v6 = vsel %vm615_vm9, 1.0, %v909_v1  ;;  %vm617_vm11 = vcmp.eq.s32.totalorder %v322_v0, %v1037_v56  ;;  %vm703_vm7 = vcmask 0   ;;  %p891_p2 = scmp.lt.s32.totalorder %s889_s30, %s885_s29 }
  0x14   :  { %vm370_vm5 = vmand %vm338_vm2, %vm354_vm3  ;;  %vm618_vm12 = vcmp.eq.s32.totalorder %v323_v5, %v1037_v56 }
  0x15   :  { %v739_v54 = vsel %vm370_vm5, 1.0, %v909_v1  ;;  %p892_p3 = por %p891_p2, %p890_p1 }
  0x16   :  { %805 = vmatpush3.bf16.msra.mxu1 %v872_v7 }
  0x17   :  { %806 = vmatprep.subr.bf16.mxu1 %v909_v1  ;;  %p893_p4 = pnand %p892_p3, %p886_p0 }
  0x1a   :  { %807 = vmatpush3.bf16.msra.mxu1 %v873_v8 }
  0x1b   :  { %808 = vmatprep.subr.bf16.mxu1 %v909_v1 }
  0x1e   :  { %809 = vmatpush3.bf16.msra.mxu1 %v874_v9  ;;  %v324_v9 = vadd.s32 48, %v1011_v41 }
  0x1f   :  { %810 = vmatprep.subr.bf16.mxu1 %v909_v1 }
  0x20   :  { %vm619_vm13 = vcmp.eq.s32.totalorder %v324_v9, %v1037_v56 }
  0x22   :  { %811 = vmatpush3.bf16.msra.mxu1 %v875_v10  ;;  %v744_v10 = vsel %vm616_vm10, 1.0, %v909_v1 }
  0x23   :  { %812 = vmatprep.subr.bf16.mxu1 %v909_v1 }
  0x26   :  { %813 = vmatpush3.bf16.msra.mxu1 %v876_v11 }
  0xdc   :  { %v95_v13 = vpop.f32.mrb[0].mxu1 }
  0xdd   :  { %v96_v14 = vadd.f32 %v723_v12, %v95_v13  ;;  %v796_v15 = vpop.f32.mrb[1].mxu1  ;;  %v325_v13 = vadd.s32 56, %v1011_v41 }
  0xde   :  { %v98_v16 = vpop.f32.mrb[2].mxu1 }
  0xdf   :  { %v99_v17 = vadd.f32 %v723_v12, %v98_v16  ;;  %v797_v18 = vpop.f32.mrb[3].mxu1  ;;  %v102_v19 = vmax.f32 %v96_v14, 0.0  ;;  %v745_v14 = vsel %vm617_vm11, 1.0, %v909_v1  ;;  %vm620_vm14 = vcmp.eq.s32.totalorder %v325_v13, %v1037_v56 }
  0xe0   :  { %v326_v18 = vadd.s32 64, %v1011_v41 }
  0xe1   :  { %v103_v20 = vmax.f32 %v99_v17, 0.0 }
  0xe2   :  { %vm621_vm15 = vcmp.eq.s32.totalorder %v326_v18, %v1037_v56 }
  0xe3   :  { %v104_v21 = vpack.c.bf16 %v103_v20, %v102_v19  ;;  %v746_v19 = vsel %vm618_vm12, 1.0, %v909_v1 }
  0xe5   :  { %815 = vmatmul.mubr.bf16.vlgmr.msra.gmra.mrb[4].mxu1 %v104_v21 }
 0x1b8   :  { %v210_v23 = vpop.f32.mrb[4].mxu1 }
 0x1b9   :  { %v211_v24 = vadd.f32 %v728_v22, %v210_v23  ;;  %v816_v25 = vpop.f32.mrb[5].mxu1  ;;  %v327_v23 = vadd.s32 72, %v1011_v41 }
 0x1ba   :  { %v213_v26 = vpop.f32.mrb[6].mxu1 }
 0x1bb   :  { %217 = vst [vmem:[%s1107_s6] sm:$0xff] %v211_v24  ;;  %v214_v27 = vadd.f32 %v728_v22, %v213_v26  ;;  %223 = vmax.xlane.f32.xlu0 %v211_v24  ;;  %v817_v28 = vpop.f32.mrb[7].mxu1  ;;  %vm622_vm0 = vcmp.eq.s32.totalorder %v327_v23, %v1037_v56 }
 0x1bc   :  { %v328_v28 = vadd.s32 80, %v1011_v41  ;;  %v750_v39 = vsel %vm622_vm0, 1.0, %v909_v1 }
 0x1bd   :  { %218 = vst [vmem:[%s1107_s6 + $0x8] sm:$0xff] %v214_v27  ;;  %v856_v52 = vpack.c.bf16 %v214_v27, %v211_v24 }
 0x1be   :  { %vm623_vm1 = vcmp.eq.s32.totalorder %v328_v28, %v1037_v56 }
 0x1bf   :  { %225 = vmax.xlane.f32.xlu0 %v214_v27  ;;  %v751_v45 = vsel %vm623_vm1, 1.0, %v909_v1 }
 0x248   :  { %v224_v29 = vpop.xlane.xlu0 %223 }
 0x249   :  { %v227_v30 = vsub.f32 %v211_v24, %v224_v29  ;;  %v747_v24 = vsel %vm619_vm13, 1.0, %v909_v1 }
 0x24b   :  { %v229_v31 = vmul.f32 1.442695, %v227_v30 }
 0x24c   :  { %v226_v32 = vpop.xlane.xlu0 %225 }
 0x24d   :  { %v228_v33 = vsub.f32 %v214_v27, %v226_v32  ;;  %877 = vpow2.f32 %v229_v31 }
 0x24f   :  { %v231_v34 = vmul.f32 1.442695, %v228_v33  ;;  %v329_v33 = vadd.s32 88, %v1011_v41 }
 0x251   :  { %879 = vpow2.f32 %v231_v34  ;;  %v749_v34 = vsel %vm621_vm15, 1.0, %v909_v1  ;;  %vm624_vm2 = vcmp.eq.s32.totalorder %v329_v33, %v1037_v56 }
 0x257   :  { %v878_v35 = vpop.eup %877 }
 0x258   :  { %233 = vadd.xlane.f32.xlu1 %v878_v35 }
 0x25b   :  { %v880_v36 = vpop.eup %879 }
 0x25c   :  { %235 = vadd.xlane.f32.xlu1 %v880_v36 }
 0x2e5   :  { %v234_v38 = vpop.xlane.xlu1 %233 }
 0x2e6   :  { %881 = vlog2.f32 %v234_v38  ;;  %v330_v38 = vadd.s32 96, %v1011_v41 }
 0x2e8   :  { %vm625_vm3 = vcmp.eq.s32.totalorder %v330_v38, %v1037_v56 }
 0x2e9   :  { %v236_v40 = vpop.xlane.xlu1 %235  ;;  %v753_v55 = vsel %vm625_vm3, 1.0, %v909_v1 }
 0x2ea   :  { %883 = vlog2.f32 %v236_v40 }
 0x2f0   :  { %v882_v44 = vpop.eup %881 }
 0x2f1   :  { %v238_v46 = vmul.f32 0.6931472, %v882_v44  ;;  %v331_v44 = vadd.s32 104, %v1011_v41 }
 0x2f3   :  { %v241_v49 = vadd.f32 %v238_v46, %v224_v29  ;;  %v748_v29 = vsel %vm620_vm14, 1.0, %v909_v1  ;;  %vm626_vm4 = vcmp.eq.s32.totalorder %v331_v44, %v1037_v56 }
 0x2f4   :  { %v884_v47 = vpop.eup %883  ;;  %v754_v61 = vsel %vm626_vm4, 1.0, %v909_v1 }
 0x2f5   :  { %v240_v48 = vmul.f32 0.6931472, %v884_v47 }
 0x2f7   :  { %v242_v50 = vadd.f32 %v240_v48, %v226_v32 }
 0x2f9   :  { %v854_v51 = vpack.c.bf16 %v242_v50, %v241_v49  ;;  %v332_v49 = vadd.s32 112, %v1011_v41  ;;  %v752_v50 = vsel %vm624_vm2, 1.0, %v909_v1 }
 0x2fb   :  { %855 = vmatpush3.bf16.msra.mxu0 %v854_v51  ;;  %vm627_vm5 = vcmp.eq.s32.totalorder %v332_v49, %v1037_v56 }
 0x2fc   :  { %857 = vmatprep.subr.bf16.mxu0 %v856_v52 }
 0x2fe   :  { %823 = vmatmul.mubr.msk.f32.vlgmr.msra.gmra.mrb[0].mxu0 %vm243_vm6, %v737_v53 }
 0x2ff   :  { %859 = vmatpush3.bf16.msra.mxu0 %v856_v52  ;;  %829 = vmatprep.mubr.msk.f32.mxu0 %vm243_vm6, %v739_v54  ;;  %v333_v54 = vadd.s32 120, %v1011_v41 }
 0x301   :  { %vm628_vm6 = vcmp.eq.s32.totalorder %v333_v54, %v1037_v56 }
 0x302   :  { %830 = vmatmul.mubr.f32.vlgmr.msra.gmra.mrb[2].mxu0 %v909_v1  ;;  %v756_v41 = vsel %vm628_vm6, 1.0, %v909_v1 }
 0x303   :  { %832 = vmatprep.mubr.f32.mxu0 %v909_v1 }
 0x306   :  { %833 = vmatmul.mubr.f32.gmra.mrb[4].mxu0 %v909_v1 }
 0x307   :  { %835 = vmatprep.mubr.f32.mxu0 %v909_v1 }
 0x30a   :  { %836 = vmatmul.mubr.f32.gmra.mrb[6].mxu0 %v909_v1 }
 0x30b   :  { %838 = vmatprep.mubr.f32.mxu0 %v909_v1 }
 0x30e   :  { %839 = vmatmul.mubr.f32.gmra.mrb[8].mxu0 %v909_v1 }
 0x30f   :  { %841 = vmatprep.mubr.f32.mxu0 %v909_v1 }
 0x312   :  { %842 = vmatmul.mubr.f32.gmra.mrb[10].mxu0 %v909_v1 }
 0x313   :  { %844 = vmatprep.mubr.f32.mxu0 %v909_v1 }
 0x316   :  { %845 = vmatmul.mubr.f32.gmra.mrb[12].mxu0 %v909_v1 }
 0x317   :  { %847 = vmatprep.mubr.f32.mxu0 %v909_v1 }
 0x31a   :  { %848 = vmatmul.mubr.f32.gmra.mrb[14].mxu0 %v909_v1 }
 0x31b   :  { %850 = vmatprep.mubr.f32.mxu0 %v909_v1 }
 0x31e   :  { %851 = vmatmul.mubr.f32.gmra.mrb[16].mxu0 %v909_v1 }
 0x3d1   :  { %v1040_v57 = vpop.f32.mrb[0].mxu0 }
 0x3d2   :  { %v824_v59 = vpop.f32.mrb[1].mxu0 }
 0x3d5   :  { %v831_v63 = vpop.f32.mrb[2].mxu0 }
 0x3d6   :  { %v662_v2 = vmul.f32 %v831_v63, %v742_v60  ;;  %v532_v3 = vpop.f32.mrb[3].mxu0 }
 0x3d7   :  { %v661_v4 = vmul.f32 %v741_v62, %v532_v3 }
 0x3d9   :  { %v677_v7 = vadd.f32 %v662_v2, %v661_v4  ;;  %v834_v8 = vpop.f32.mrb[4].mxu0  ;;  %v755_v2 = vsel %vm627_vm5, 1.0, %v909_v1 }
 0x3da   :  { %v542_v11 = vpop.f32.mrb[5].mxu0  ;;  %v664_v15 = vmul.f32 %v834_v8, %v744_v10 }
 0x3db   :  { %v663_v12 = vmul.f32 %v743_v6, %v542_v11 }
 0x3dd   :  { %v678_v16 = vadd.f32 %v677_v7, %v663_v12  ;;  %v837_v17 = vpop.f32.mrb[6].mxu0 }
 0x3de   :  { %v552_v20 = vpop.f32.mrb[7].mxu0  ;;  %v666_v25 = vmul.f32 %v837_v17, %v746_v19 }
 0x3df   :  { %v665_v21 = vmul.f32 %v745_v14, %v552_v20  ;;  %v679_v22 = vadd.f32 %v678_v16, %v664_v15 }
 0x3e1   :  { %v680_v26 = vadd.f32 %v679_v22, %v665_v21  ;;  %v840_v27 = vpop.f32.mrb[8].mxu0 }
 0x3e2   :  { %v562_v30 = vpop.f32.mrb[9].mxu0  ;;  %v668_v35 = vmul.f32 %v840_v27, %v748_v29 }
 0x3e3   :  { %v667_v31 = vmul.f32 %v747_v24, %v562_v30  ;;  %v681_v32 = vadd.f32 %v680_v26, %v666_v25 }
 0x3e5   :  { %v682_v36 = vadd.f32 %v681_v32, %v667_v31  ;;  %v843_v37 = vpop.f32.mrb[10].mxu0 }
 0x3e6   :  { %v572_v40 = vpop.f32.mrb[11].mxu0  ;;  %v670_v46 = vmul.f32 %v843_v37, %v750_v39 }
 0x3e7   :  { %v669_v42 = vmul.f32 %v749_v34, %v572_v40  ;;  %v683_v43 = vadd.f32 %v682_v36, %v668_v35 }
 0x3e9   :  { %v684_v47 = vadd.f32 %v683_v43, %v669_v42  ;;  %v846_v48 = vpop.f32.mrb[12].mxu0 }
 0x3ea   :  { %v582_v51 = vpop.f32.mrb[13].mxu0  ;;  %v672_v58 = vmul.f32 %v846_v48, %v752_v50 }
 0x3eb   :  { %v671_v52 = vmul.f32 %v751_v45, %v582_v51  ;;  %v685_v53 = vadd.f32 %v684_v47, %v670_v46 }
 0x3ed   :  { %v686_v59 = vadd.f32 %v685_v53, %v671_v52  ;;  %v849_v60 = vpop.f32.mrb[14].mxu0 }
 0x3ee   :  { %v592_v62 = vpop.f32.mrb[15].mxu0  ;;  %v674_v3 = vmul.f32 %v849_v60, %v754_v61 }
 0x3ef   :  { %v673_v63 = vmul.f32 %v753_v55, %v592_v62  ;;  %v687_v0 = vadd.f32 %v686_v59, %v672_v58 }
 0x3f1   :  { %v688_v4 = vadd.f32 %v687_v0, %v673_v63  ;;  %v852_v5 = vpop.f32.mrb[16].mxu0 }
 0x3f2   :  { %v602_v6 = vpop.f32.mrb[17].mxu0  ;;  %v676_v9 = vmul.f32 %v852_v5, %v756_v41 }
 0x3f3   :  { %v675_v7 = vmul.f32 %v755_v2, %v602_v6  ;;  %v689_v8 = vadd.f32 %v688_v4, %v674_v3 }
 0x3f5   :  { %v690_v10 = vadd.f32 %v689_v8, %v675_v7 }
 0x3f7   :  { %v691_v11 = vadd.f32 %v690_v10, %v676_v9 }
 0x3f9   :  { %692 = vadd.xlane.f32.xlu0 %v691_v11 }
 0x486   :  { %v693_v12 = vpop.xlane.xlu0 %692 }
 0x487   :  { %v694_v13 = vrot.slane %v693_v12, 4 }
 0x489   :  { %v695_v14 = vadd.f32 %v694_v13, %v693_v12 }
 0x48b   :  { %v696_v15 = vrot.slane %v695_v14, 2 }
 0x48d   :  { %v697_v16 = vadd.f32 %v696_v15, %v695_v14 }
 0x48f   :  { %v698_v56 = vrot.slane %v697_v16, 1 }
 0x491   :  { %v699_v17 = vadd.f32 %v698_v56, %v697_v16 }
 0x493   :  { %860 = vpush %v699_v17 }
 0x4c4   :  { %s861_s28 = spop %860 }
 0x4c5   :  { %v701_v18 = vstv %s861_s28 }
 0x4c6   :  { %v702_v1 = vsub.f32 %v1040_v57, %v701_v18 }
 0x4c8   :  { %704 = vst.msk [vmem:[#allocation2] sm:$0x1] %vm703_vm7, %v702_v1 }
 0x4c9   :  { %896 = shalt.err (!%p893_p4)
}
 0x4ca   :  { %s897_s9 = scalar_lea.hbm %s1108_s7, 16 }
 0x4cb   :  { %p898_p5 = scmp.ne.s32.totalorder %s1108_s7, %s897_s9  ;;  %p901_p6 = scmp.lt.u32.totalorder %s897_s9, %s1108_s7 }
 0x4cd   :  { %p903_p7 = pnand %p901_p6, %p898_p5 }
 0x4cf   :  { %906 = shalt.err (!%p903_p7)
}
 0x4d0   :  { %716 = dma.vmem_to_hbm [thread:$0]  %s714_s27, 16, %s1108_s7, [#allocation3]  }
 0x4d1   :  { %907 = dma.done.wait [#allocation3], 16  }
 0x4d2   :  { %908 = vsyncadd [#allocation3], 4294967280 }
 0x4d3   :  { %722 = vsyncpa [#allocation3], 1 }

</bundles_post_ra>
